<compile_context>
chip_gen: v7x
topology: tpu7x:2x2x1
jax: 0.10.0
libtpu: 0.0.40
codegen_flags: <defaults>
</compile_context>

<pallas_src>
import math

import jax
import jax.numpy as jnp
from jax.experimental import pallas as pl
from jax.experimental.pallas import tpu as pltpu


# ------------------------------ Pallas kernel -------------------------------

def _mask_embedding_kernel(x_ref, w1_ref, b1_ref, w2_ref, b2_ref, memb_ref,
                           mask_ref, pe_ref, o_ref, x32_ref, h_ref):
    """Fused ConvEncoder (two k=3, stride=2, pad=1 convs) + mask blend + PE.

    Per grid step (one batch element):
      x_ref   : (Tp, Cin)      bf16  padded input (conv padding pre-applied)
      w1_ref  : (K, Cin, C1p)  f32   conv1 weight as per-tap matrices
      b1_ref  : (1, C1p)       f32
      w2_ref  : (K, C1p, C2p)  f32   conv2 weight * xscale
      b2_ref  : (1, C2p)       f32   conv2 bias   * xscale
      memb_ref: (1, C2p)       f32   mask_emb     * xscale
      mask_ref: (T2, 1)        f32   1.0 where masked
      pe_ref  : (T2, C2p)      f32   sinusoidal positional encoding
      o_ref   : (T2, C2p)      f32
      x32_ref : (Tp, Cin)      f32   VMEM scratch (f32 copy of the x block)
      h_ref   : (T1+2, C1p)    f32   VMEM scratch (conv1 output + pad rows)
    """
    k_taps = w1_ref.shape[0]
    t1 = h_ref.shape[0] - 2
    c1p = h_ref.shape[1]
    t2, c2p = o_ref.shape

    # f32 working copy of the bf16 activation block; keeps the strided
    # sublane loads below on a plain 32-bit layout.
    x32_ref[...] = x_ref[...].astype(jnp.float32)

    # ---- conv1 (stride 2) + bias + ReLU --------------------------------
    acc1 = jnp.zeros((t1, c1p), jnp.float32)
    for k in range(k_taps):
        acc1 = acc1 + jnp.dot(x32_ref[pl.ds(k, t1, stride=2), :], w1_ref[k],
                              preferred_element_type=jnp.float32)
    h = jnp.maximum(acc1 + b1_ref[...], 0.0)

    # Stash h in VMEM with one zero row of conv padding on each side.
    h_ref[...] = jnp.zeros_like(h_ref)
    h_ref[pl.ds(1, t1), :] = h

    # ---- conv2 (stride 2) + bias (xscale already folded in) ------------
    acc2 = jnp.zeros((t2, c2p), jnp.float32)
    for k in range(k_taps):
        acc2 = acc2 + jnp.dot(h_ref[pl.ds(k, t2, stride=2), :], w2_ref[k],
                              preferred_element_type=jnp.float32)
    y = acc2 + b2_ref[...]

    # ---- mask-embedding blend + positional encoding --------------------
    masked = mask_ref[...] > 0.5                       # (T2, 1)
    o_ref[...] = jnp.where(masked, memb_ref[...], y) + pe_ref[...]


# ------------------------------- JAX wrapper ---------------------------------

def _round_up(n, m):
    return (n + m - 1) // m * m


def _sinusoidal_pe(length, d_model):
    """espnet PositionalEncoding table: pe[t, 2i]=sin, pe[t, 2i+1]=cos."""
    position = jnp.arange(length, dtype=jnp.float32)[:, None]
    div_term = jnp.exp(jnp.arange(0, d_model, 2, dtype=jnp.float32)
                       * -(math.log(10000.0) / d_model))
    pe = jnp.zeros((length, d_model), jnp.float32)
    pe = pe.at[:, 0::2].set(jnp.sin(position * div_term))
    pe = pe.at[:, 1::2].set(jnp.cos(position * div_term))
    return pe


def prepare_params(raw, idim, lane=128):
    """Re-layout PyTorch Conv1d weights as per-tap (Cin, Cout) matrices,
    pad channel dims to lane multiples, fold xscale into conv2/mask_emb."""
    C1, C2 = idim // 2, idim // 4
    C1p, C2p = _round_up(C1, lane), _round_up(C2, lane)
    xscale = float(math.sqrt(C2))

    w1 = jnp.transpose(raw["w1"], (2, 1, 0))                   # (K, Cin, C1)
    w1 = jnp.pad(w1, ((0, 0), (0, 0), (0, C1p - C1)))
    b1 = jnp.pad(raw["b1"], (0, C1p - C1))[None, :]

    w2 = jnp.transpose(raw["w2"], (2, 1, 0))                   # (K, C1, C2)
    w2 = jnp.pad(w2, ((0, 0), (0, C1p - C1), (0, C2p - C2))) * xscale
    b2 = (jnp.pad(raw["b2"], (0, C2p - C2)) * xscale)[None, :]
    memb = (jnp.pad(raw["mask_emb"], (0, C2p - C2)) * xscale)[None, :]

    return {
        "w1_taps": w1.astype(jnp.float32),
        "b1_row": b1.astype(jnp.float32),
        "w2_taps": w2.astype(jnp.float32),
        "b2_row": b2.astype(jnp.float32),
        "memb_row": memb.astype(jnp.float32),
    }


def mask_embedding_forward(x, mask, params):
    """x: (B, T, idim) f32, mask: (B, T2) bool -> (B, T2, idim // 4) f32."""
    B, T, idim = x.shape
    K, stride, conv_pad = 3, 2, 1
    C2 = idim // 4
    C1p = params["w1_taps"].shape[-1]
    C2p = params["w2_taps"].shape[-1]
    T1 = (T + 2 * conv_pad - K) // stride + 1
    T2 = (T1 + 2 * conv_pad - K) // stride + 1
    Tp = T + 2 * conv_pad
    assert mask.shape == (B, T2), (mask.shape, (B, T2))

    # bf16 activations halve the dominant HBM stream; accumulation stays f32.
    x_pad = jnp.pad(x, ((0, 0), (conv_pad, conv_pad), (0, 0))).astype(jnp.bfloat16)
    mask_f = mask.astype(jnp.float32)[..., None]                # (B, T2, 1)
    pe = jnp.pad(_sinusoidal_pe(T2, C2), ((0, 0), (0, C2p - C2)))

    flops = 2 * B * (T1 * K * idim * C1p + T2 * K * C1p * C2p)
    bytes_accessed = (x_pad.size * 2 + B * T2 * (C2p + 1) * 4 + pe.size * 4
                      + 4 * sum(params[k].size for k in params))

    out = pl.pallas_call(
        _mask_embedding_kernel,
        out_shape=jax.ShapeDtypeStruct((B, T2, C2p), jnp.float32),
        grid_spec=pltpu.PrefetchScalarGridSpec(
            num_scalar_prefetch=0,
            grid=(B,),
            in_specs=[
                pl.BlockSpec((None, Tp, idim), lambda b: (b, 0, 0)),   # x
                pl.BlockSpec((K, idim, C1p), lambda b: (0, 0, 0)),     # w1
                pl.BlockSpec((1, C1p), lambda b: (0, 0)),              # b1
                pl.BlockSpec((K, C1p, C2p), lambda b: (0, 0, 0)),      # w2*xs
                pl.BlockSpec((1, C2p), lambda b: (0, 0)),              # b2*xs
                pl.BlockSpec((1, C2p), lambda b: (0, 0)),              # memb*xs
                pl.BlockSpec((None, T2, 1), lambda b: (b, 0, 0)),      # mask
                pl.BlockSpec((T2, C2p), lambda b: (0, 0)),             # pe
            ],
            out_specs=pl.BlockSpec((None, T2, C2p), lambda b: (b, 0, 0)),
            scratch_shapes=[
                pltpu.VMEM((Tp, idim), jnp.float32),      # f32 copy of x tile
                pltpu.VMEM((T1 + 2, C1p), jnp.float32),   # padded conv1 output
            ],
        ),
        compiler_params=pltpu.CompilerParams(
            dimension_semantics=("parallel",)),
        cost_estimate=pl.CostEstimate(flops=int(flops), transcendentals=0,
                                      bytes_accessed=int(bytes_accessed)),
    )(x_pad, params["w1_taps"], params["b1_row"], params["w2_taps"],
      params["b2_row"], params["memb_row"], mask_f, pe)

    return out[:, :, :C2]


# ---------------------------- pure-JAX reference -----------------------------

def _im2col(x, kernel_size, stride, padding):
    B, T, C = x.shape
    x_pad = jnp.pad(x, ((0, 0), (padding, padding), (0, 0)))
    T_out = (T + 2 * padding - kernel_size) // stride + 1
    cols = [x_pad[:, k:k + stride * T_out:stride, :] for k in range(kernel_size)]
    win = jnp.stack(cols, axis=2)                        # (B, T_out, K, C)
    return win.reshape(B, T_out, kernel_size * C), T_out


def _flatten_conv_weight(w):
    C_out, C_in, K = w.shape
    return jnp.transpose(w, (2, 1, 0)).reshape(K * C_in, C_out)


def _reference(x, mask, raw):
    hi = jax.lax.Precision.HIGHEST
    B, T, idim = x.shape
    C2 = idim // 4
    win1, _ = _im2col(x, 3, 2, 1)
    h = jnp.maximum(
        jnp.einsum("btk,kc->btc", win1, _flatten_conv_weight(raw["w1"]),
                   precision=hi) + raw["b1"], 0.0)
    win2, T2 = _im2col(h, 3, 2, 1)
    y = jnp.einsum("btk,kc->btc", win2, _flatten_conv_weight(raw["w2"]),
                   precision=hi) + raw["b2"]
    blended = jnp.where(mask[..., None], raw["mask_emb"], y)
    return blended * math.sqrt(C2) + _sinusoidal_pe(T2, C2)[None]


# ------------------------------------ main -----------------------------------

if __name__ == "__main__":
    B, T, idim = 2, 8, 32
    C2 = idim // 4                               # 8
    T1 = (T + 2 - 3) // 2 + 1                    # 4
    T2 = (T1 + 2 - 3) // 2 + 1                   # 2

    key = jax.random.PRNGKey(0)
    kx, kw1, kb1, kw2, kb2, kme, kmask = jax.random.split(key, 7)

    # Round x to bf16-representable values so the kernel's bf16 activation
    # stream is lossless relative to the f32 reference.
    x = jax.random.normal(kx, (B, T, idim), jnp.float32)
    x = x.astype(jnp.bfloat16).astype(jnp.float32)
    mask = jax.random.bernoulli(kmask, 0.5, (B, T2))     # bool, subsampled len

    raw = {
        "w1": jax.random.normal(kw1, (idim // 2, idim, 3), jnp.float32) * 0.1,
        "b1": jax.random.normal(kb1, (idim // 2,), jnp.float32) * 0.1,
        "w2": jax.random.normal(kw2, (idim // 4, idim // 2, 3), jnp.float32) * 0.1,
        "b2": jax.random.normal(kb2, (idim // 4,), jnp.float32) * 0.1,
        "mask_emb": jax.random.normal(kme, (idim // 4,), jnp.float32) * 0.02,
    }
    params = prepare_params(raw, idim)

    out = jax.block_until_ready(mask_embedding_forward(x, mask, params))
    ref = jax.block_until_ready(_reference(x, mask, raw))

    assert out.shape == (B, T2, C2), out.shape
    err = float(jnp.max(jnp.abs(out - ref)))
    assert jnp.allclose(out, ref, rtol=2e-3, atol=2e-3), f"max |err| = {err}"

    print("KERNEL_OK")
</pallas_src>

<mosaic_0001>
module attributes {stable_mosaic.version = 11 : i64} {
  func.func @_mask_embedding_kernel(%arg0: i32, %arg1: memref<1x10x32xbf16, #tpu.memory_space<vmem>>, %arg2: memref<3x32x128xf32, #tpu.memory_space<vmem>>, %arg3: memref<1x128xf32, #tpu.memory_space<vmem>>, %arg4: memref<3x128x128xf32, #tpu.memory_space<vmem>>, %arg5: memref<1x128xf32, #tpu.memory_space<vmem>>, %arg6: memref<1x128xf32, #tpu.memory_space<vmem>>, %arg7: memref<1x2x1xf32, #tpu.memory_space<vmem>>, %arg8: memref<2x128xf32, #tpu.memory_space<vmem>>, %arg9: memref<1x2x128xf32, #tpu.memory_space<vmem>>, %arg10: memref<10x32xf32, #tpu.memory_space<vmem>>, %arg11: memref<6x128xf32, #tpu.memory_space<vmem>>) attributes {dimension_semantics = [#tpu.dimension_semantics<parallel>], iteration_bounds = array<i64: 2>, scalar_prefetch = 0 : i64, scratch_operands = 2 : i64, tpu.core_type = #tpu.core_type<tc>, window_params = [{transform_indices = @transform_0, window_bounds = array<i64: 1, 10, 32>}, {pipeline_mode = #tpu.pipeline_mode<synchronous>, transform_indices = @transform_1, window_bounds = array<i64: 3, 32, 128>}, {pipeline_mode = #tpu.pipeline_mode<synchronous>, transform_indices = @transform_2, window_bounds = array<i64: 1, 128>}, {pipeline_mode = #tpu.pipeline_mode<synchronous>, transform_indices = @transform_3, window_bounds = array<i64: 3, 128, 128>}, {pipeline_mode = #tpu.pipeline_mode<synchronous>, transform_indices = @transform_4, window_bounds = array<i64: 1, 128>}, {pipeline_mode = #tpu.pipeline_mode<synchronous>, transform_indices = @transform_5, window_bounds = array<i64: 1, 128>}, {transform_indices = @transform_6, window_bounds = array<i64: 1, 2, 1>}, {pipeline_mode = #tpu.pipeline_mode<synchronous>, transform_indices = @transform_7, window_bounds = array<i64: 2, 128>}, {transform_indices = @transform_8, window_bounds = array<i64: 1, 2, 128>}]} {
    %c0 = arith.constant 0 : index
    %c0_0 = arith.constant 0 : index
    %c0_1 = arith.constant 0 : index
    %0 = vector.load %arg1[%c0, %c0_0, %c0_1] : memref<1x10x32xbf16, #tpu.memory_space<vmem>>, vector<1x10x32xbf16>
    %1 = vector.shape_cast %0 : vector<1x10x32xbf16> to vector<10x32xbf16>
    %2 = arith.extf %1 : vector<10x32xbf16> to vector<10x32xf32>
    %c0_2 = arith.constant 0 : index
    %c0_3 = arith.constant 0 : index
    %3 = vector.load %arg10[%c0_2, %c0_3] : memref<10x32xf32, #tpu.memory_space<vmem>>, vector<10x32xf32>
    tpu.vector_store %arg10[%c0_2, %c0_3], %2 {strides = array<i32>} : memref<10x32xf32, #tpu.memory_space<vmem>>, vector<10x32xf32>,
    %cst = arith.constant 0.000000e+00 : f32
    %4 = vector.broadcast %cst : f32 to vector<4x128xf32>
    %c0_4 = arith.constant 0 : index
    %c0_5 = arith.constant 0 : index
    %5 = tpu.strided_load %arg10[%c0_4, %c0_5] {strides = array<i32: 2, 1>} : memref<10x32xf32, #tpu.memory_space<vmem>>, vector<4x32xf32>
    %c0_6 = arith.constant 0 : index
    %c0_7 = arith.constant 0 : index
    %c0_8 = arith.constant 0 : index
    %6 = vector.load %arg2[%c0_6, %c0_7, %c0_8] : memref<3x32x128xf32, #tpu.memory_space<vmem>>, vector<1x32x128xf32>
    %7 = vector.shape_cast %6 : vector<1x32x128xf32> to vector<32x128xf32>
    %cst_9 = arith.constant dense<0.000000e+00> : vector<4x128xf32>
    %8 = tpu.matmul %5, %7, %cst_9 {dimension_numbers = #tpu.dot_dimension_numbers<[1], [0], [0], [1], [0, 0, 1, 1], [], []>} : vector<4x32xf32>, vector<32x128xf32>, vector<4x128xf32> -> vector<4x128xf32>
    %9 = arith.addf %4, %8 : vector<4x128xf32>
    %c1 = arith.constant 1 : index
    %c0_10 = arith.constant 0 : index
    %10 = tpu.strided_load %arg10[%c1, %c0_10] {strides = array<i32: 2, 1>} : memref<10x32xf32, #tpu.memory_space<vmem>>, vector<4x32xf32>
    %c1_11 = arith.constant 1 : index
    %c0_12 = arith.constant 0 : index
    %c0_13 = arith.constant 0 : index
    %11 = vector.load %arg2[%c1_11, %c0_12, %c0_13] : memref<3x32x128xf32, #tpu.memory_space<vmem>>, vector<1x32x128xf32>
    %12 = vector.shape_cast %11 : vector<1x32x128xf32> to vector<32x128xf32>
    %cst_14 = arith.constant dense<0.000000e+00> : vector<4x128xf32>
    %13 = tpu.matmul %10, %12, %cst_14 {dimension_numbers = #tpu.dot_dimension_numbers<[1], [0], [0], [1], [0, 0, 1, 1], [], []>} : vector<4x32xf32>, vector<32x128xf32>, vector<4x128xf32> -> vector<4x128xf32>
    %14 = arith.addf %9, %13 : vector<4x128xf32>
    %c2 = arith.constant 2 : index
    %c0_15 = arith.constant 0 : index
    %15 = tpu.strided_load %arg10[%c2, %c0_15] {strides = array<i32: 2, 1>} : memref<10x32xf32, #tpu.memory_space<vmem>>, vector<4x32xf32>
    %c2_16 = arith.constant 2 : index
    %c0_17 = arith.constant 0 : index
    %c0_18 = arith.constant 0 : index
    %16 = vector.load %arg2[%c2_16, %c0_17, %c0_18] : memref<3x32x128xf32, #tpu.memory_space<vmem>>, vector<1x32x128xf32>
    %17 = vector.shape_cast %16 : vector<1x32x128xf32> to vector<32x128xf32>
    %cst_19 = arith.constant dense<0.000000e+00> : vector<4x128xf32>
    %18 = tpu.matmul %15, %17, %cst_19 {dimension_numbers = #tpu.dot_dimension_numbers<[1], [0], [0], [1], [0, 0, 1, 1], [], []>} : vector<4x32xf32>, vector<32x128xf32>, vector<4x128xf32> -> vector<4x128xf32>
    %19 = arith.addf %14, %18 : vector<4x128xf32>
    %c0_20 = arith.constant 0 : index
    %c0_21 = arith.constant 0 : index
    %20 = vector.load %arg3[%c0_20, %c0_21] : memref<1x128xf32, #tpu.memory_space<vmem>>, vector<1x128xf32>
    %21 = vector.broadcast %20 : vector<1x128xf32> to vector<4x128xf32>
    %22 = arith.addf %19, %21 : vector<4x128xf32>
    %cst_22 = arith.constant 0.000000e+00 : f32
    %23 = vector.broadcast %cst_22 : f32 to vector<4x128xf32>
    %24 = arith.maximumf %22, %23 : vector<4x128xf32>
    %cst_23 = arith.constant 0.000000e+00 : f32
    %25 = vector.broadcast %cst_23 : f32 to vector<6x128xf32>
    %c0_24 = arith.constant 0 : index
    %c0_25 = arith.constant 0 : index
    %26 = vector.load %arg11[%c0_24, %c0_25] : memref<6x128xf32, #tpu.memory_space<vmem>>, vector<6x128xf32>
    tpu.vector_store %arg11[%c0_24, %c0_25], %25 {strides = array<i32>} : memref<6x128xf32, #tpu.memory_space<vmem>>, vector<6x128xf32>,
    %c1_26 = arith.constant 1 : index
    %c0_27 = arith.constant 0 : index
    %27 = vector.load %arg11[%c1_26, %c0_27] : memref<6x128xf32, #tpu.memory_space<vmem>>, vector<4x128xf32>
    tpu.vector_store %arg11[%c1_26, %c0_27], %24 {strides = array<i32>} : memref<6x128xf32, #tpu.memory_space<vmem>>, vector<4x128xf32>,
    %cst_28 = arith.constant 0.000000e+00 : f32
    %28 = vector.broadcast %cst_28 : f32 to vector<2x128xf32>
    %c0_29 = arith.constant 0 : index
    %c0_30 = arith.constant 0 : index
    %29 = tpu.strided_load %arg11[%c0_29, %c0_30] {strides = array<i32: 2, 1>} : memref<6x128xf32, #tpu.memory_space<vmem>>, vector<2x128xf32>
    %c0_31 = arith.constant 0 : index
    %c0_32 = arith.constant 0 : index
    %c0_33 = arith.constant 0 : index
    %30 = vector.load %arg4[%c0_31, %c0_32, %c0_33] : memref<3x128x128xf32, #tpu.memory_space<vmem>>, vector<1x128x128xf32>
    %31 = vector.shape_cast %30 : vector<1x128x128xf32> to vector<128x128xf32>
    %cst_34 = arith.constant dense<0.000000e+00> : vector<2x128xf32>
    %32 = tpu.matmul %29, %31, %cst_34 {dimension_numbers = #tpu.dot_dimension_numbers<[1], [0], [0], [1], [0, 0, 1, 1], [], []>} : vector<2x128xf32>, vector<128x128xf32>, vector<2x128xf32> -> vector<2x128xf32>
    %33 = arith.addf %28, %32 : vector<2x128xf32>
    %c1_35 = arith.constant 1 : index
    %c0_36 = arith.constant 0 : index
    %34 = tpu.strided_load %arg11[%c1_35, %c0_36] {strides = array<i32: 2, 1>} : memref<6x128xf32, #tpu.memory_space<vmem>>, vector<2x128xf32>
    %c1_37 = arith.constant 1 : index
    %c0_38 = arith.constant 0 : index
    %c0_39 = arith.constant 0 : index
    %35 = vector.load %arg4[%c1_37, %c0_38, %c0_39] : memref<3x128x128xf32, #tpu.memory_space<vmem>>, vector<1x128x128xf32>
    %36 = vector.shape_cast %35 : vector<1x128x128xf32> to vector<128x128xf32>
    %cst_40 = arith.constant dense<0.000000e+00> : vector<2x128xf32>
    %37 = tpu.matmul %34, %36, %cst_40 {dimension_numbers = #tpu.dot_dimension_numbers<[1], [0], [0], [1], [0, 0, 1, 1], [], []>} : vector<2x128xf32>, vector<128x128xf32>, vector<2x128xf32> -> vector<2x128xf32>
    %38 = arith.addf %33, %37 : vector<2x128xf32>
    %c2_41 = arith.constant 2 : index
    %c0_42 = arith.constant 0 : index
    %39 = tpu.strided_load %arg11[%c2_41, %c0_42] {strides = array<i32: 2, 1>} : memref<6x128xf32, #tpu.memory_space<vmem>>, vector<2x128xf32>
    %c2_43 = arith.constant 2 : index
    %c0_44 = arith.constant 0 : index
    %c0_45 = arith.constant 0 : index
    %40 = vector.load %arg4[%c2_43, %c0_44, %c0_45] : memref<3x128x128xf32, #tpu.memory_space<vmem>>, vector<1x128x128xf32>
    %41 = vector.shape_cast %40 : vector<1x128x128xf32> to vector<128x128xf32>
    %cst_46 = arith.constant dense<0.000000e+00> : vector<2x128xf32>
    %42 = tpu.matmul %39, %41, %cst_46 {dimension_numbers = #tpu.dot_dimension_numbers<[1], [0], [0], [1], [0, 0, 1, 1], [], []>} : vector<2x128xf32>, vector<128x128xf32>, vector<2x128xf32> -> vector<2x128xf32>
    %43 = arith.addf %38, %42 : vector<2x128xf32>
    %c0_47 = arith.constant 0 : index
    %c0_48 = arith.constant 0 : index
    %44 = vector.load %arg5[%c0_47, %c0_48] : memref<1x128xf32, #tpu.memory_space<vmem>>, vector<1x128xf32>
    %45 = vector.broadcast %44 : vector<1x128xf32> to vector<2x128xf32>
    %46 = arith.addf %43, %45 : vector<2x128xf32>
    %c0_49 = arith.constant 0 : index
    %c0_50 = arith.constant 0 : index
    %c0_51 = arith.constant 0 : index
    %47 = vector.load %arg7[%c0_49, %c0_50, %c0_51] : memref<1x2x1xf32, #tpu.memory_space<vmem>>, vector<1x2x1xf32>
    %48 = vector.shape_cast %47 : vector<1x2x1xf32> to vector<2x1xf32>
    %cst_52 = arith.constant 5.000000e-01 : f32
    %49 = vector.broadcast %cst_52 : f32 to vector<2x1xf32>
    %50 = arith.cmpf ogt, %48, %49 : vector<2x1xf32>
    %c0_53 = arith.constant 0 : index
    %c0_54 = arith.constant 0 : index
    %51 = vector.load %arg6[%c0_53, %c0_54] : memref<1x128xf32, #tpu.memory_space<vmem>>, vector<1x128xf32>
    %52 = vector.shape_cast %50 : vector<2x1xi1> to vector<2x1xi1>
    %53 = vector.broadcast %52 : vector<2x1xi1> to vector<2x128xi1>
    %54 = vector.shape_cast %51 : vector<1x128xf32> to vector<1x128xf32>
    %55 = vector.broadcast %54 : vector<1x128xf32> to vector<2x128xf32>
    %56 = arith.select %53, %55, %46 : vector<2x128xi1>, vector<2x128xf32>
    %c0_55 = arith.constant 0 : index
    %c0_56 = arith.constant 0 : index
    %57 = vector.load %arg8[%c0_55, %c0_56] : memref<2x128xf32, #tpu.memory_space<vmem>>, vector<2x128xf32>
    %58 = arith.addf %56, %57 : vector<2x128xf32>
    %c0_57 = arith.constant 0 : index
    %c0_58 = arith.constant 0 : index
    %c0_59 = arith.constant 0 : index
    %59 = vector.load %arg9[%c0_57, %c0_58, %c0_59] : memref<1x2x128xf32, #tpu.memory_space<vmem>>, vector<1x2x128xf32>
    %60 = vector.shape_cast %59 : vector<1x2x128xf32> to vector<2x128xf32>
    %61 = vector.shape_cast %58 : vector<2x128xf32> to vector<1x2x128xf32>
    tpu.vector_store %arg9[%c0_57, %c0_58, %c0_59], %61 {strides = array<i32>} : memref<1x2x128xf32, #tpu.memory_space<vmem>>, vector<1x2x128xf32>,
    return
  }
  func.func @transform_0(%arg0: i32) -> (i32, i32, i32) {
    %c0_i32 = arith.constant 0 : i32
    %c0_i32_0 = arith.constant 0 : i32
    %c0_i32_1 = arith.constant 0 : i32
    return %arg0, %c0_i32, %c0_i32_0 : i32, i32, i32
  }
  func.func @transform_1(%arg0: i32) -> (i32, i32, i32) {
    %c0_i32 = arith.constant 0 : i32
    %c0_i32_0 = arith.constant 0 : i32
    %c0_i32_1 = arith.constant 0 : i32
    %c0_i32_2 = arith.constant 0 : i32
    return %c0_i32, %c0_i32_0, %c0_i32_1 : i32, i32, i32
  }
  func.func @transform_2(%arg0: i32) -> (i32, i32) {
    %c0_i32 = arith.constant 0 : i32
    %c0_i32_0 = arith.constant 0 : i32
    %c0_i32_1 = arith.constant 0 : i32
    return %c0_i32, %c0_i32_0 : i32, i32
  }
  func.func @transform_3(%arg0: i32) -> (i32, i32, i32) {
    %c0_i32 = arith.constant 0 : i32
    %c0_i32_0 = arith.constant 0 : i32
    %c0_i32_1 = arith.constant 0 : i32
    %c0_i32_2 = arith.constant 0 : i32
    return %c0_i32, %c0_i32_0, %c0_i32_1 : i32, i32, i32
  }
  func.func @transform_4(%arg0: i32) -> (i32, i32) {
    %c0_i32 = arith.constant 0 : i32
    %c0_i32_0 = arith.constant 0 : i32
    %c0_i32_1 = arith.constant 0 : i32
    return %c0_i32, %c0_i32_0 : i32, i32
  }
  func.func @transform_5(%arg0: i32) -> (i32, i32) {
    %c0_i32 = arith.constant 0 : i32
    %c0_i32_0 = arith.constant 0 : i32
    %c0_i32_1 = arith.constant 0 : i32
    return %c0_i32, %c0_i32_0 : i32, i32
  }
  func.func @transform_6(%arg0: i32) -> (i32, i32, i32) {
    %c0_i32 = arith.constant 0 : i32
    %c0_i32_0 = arith.constant 0 : i32
    %c0_i32_1 = arith.constant 0 : i32
    return %arg0, %c0_i32, %c0_i32_0 : i32, i32, i32
  }
  func.func @transform_7(%arg0: i32) -> (i32, i32) {
    %c0_i32 = arith.constant 0 : i32
    %c0_i32_0 = arith.constant 0 : i32
    %c0_i32_1 = arith.constant 0 : i32
    return %c0_i32, %c0_i32_0 : i32, i32
  }
  func.func @transform_8(%arg0: i32) -> (i32, i32, i32) {
    %c0_i32 = arith.constant 0 : i32
    %c0_i32_0 = arith.constant 0 : i32
    %c0_i32_1 = arith.constant 0 : i32
    return %arg0, %c0_i32, %c0_i32_0 : i32, i32, i32
  }
}

</mosaic_0001>

<bundles_post_ra>
// kernel: tpu_custom_call.1
= control target key start
LH: loop header
LB: loop body
LE: loop exit
PB: predicated region body
PF: predicated region fallthrough
CT: control target
= control target key end

     0   :  { %13 = vsyncpa [#allocation5], 0  ;;  %s1812_s0 = inlined_call_operand.vmem [shape: bf16[2,10,32], index: 0, kind: input, shape index: {}]   ;;  %s1813_s1 = inlined_call_operand.hbm [shape: f32[3,32,128], index: 1, kind: input, shape index: {}]   ;;  %s1814_s2 = inlined_call_operand.vmem [shape: f32[1,128], index: 2, kind: input, shape index: {}]   ;;  %s1815_s3 = inlined_call_operand.hbm [shape: f32[3,128,128], index: 3, kind: input, shape index: {}]   ;;  %s1816_s4 = inlined_call_operand.vmem [shape: f32[1,128], index: 4, kind: input, shape index: {}]   ;;  %s1817_s5 = inlined_call_operand.vmem [shape: f32[1,128], index: 5, kind: input, shape index: {}]   ;;  %s1818_s6 = inlined_call_operand.vmem [shape: f32[2,2,1], index: 6, kind: input, shape index: {}]   ;;  %s1819_s7 = inlined_call_operand.vmem [shape: f32[2,128], index: 7, kind: input, shape index: {}]   ;;  %s1820_s8 = inlined_call_operand.hbm [shape: f32[2,2,128], index: 8, kind: output, shape index: {}]  }
   0x1   :  { %14 = vsyncpa [#allocation8], 0 }
   0x2   :  { %15 = vsyncpa [#allocation6], 0 }
   0x3   :  { %17 = vsyncpa [#allocation6 + $0x1], 0  ;;  %s1574_s27 = smov 0   ;;  %s1576_s28 = smov 0  }
   0x4   :  { %s1578_s29 = smov 0   ;;  %s1580_s30 = smov 0  }
   0x5 LB: > { %1825 = sst [smem:[#allocation13_spill]] %s1514_s29  ;;  %s1595_s9 = sadd.s32 4294967295, %s1518_s30   ;;  %s1518_s30 = sphi %s1580_s30, %s1842_s30   ;;  %s1514_s29 = sphi %s1578_s29, %s1839_s29   ;;  %s1510_s28 = sphi %s1576_s28, %s1841_s28   ;;  %s1506_s27 = sphi %s1574_s27, %s1840_s27  }
   0x6   : > { %s1008_s10 = sadd.s32 4294967294, %s1518_s30   ;;  %s1599_s11 = sadd.s32 1, %s1518_s30  }
   0x7   : > { %s208_s12 = sadd.s32 1, %s1514_s29  ;;  %s205_s13 = ssub.s32 %s1518_s30, %s1599_s11 }
   0x8   : > { %p218_p0 = scmp.ne.s32.totalorder %s1514_s29, %s1510_s28  ;;  %p206_p1 = scmp.eq.s32.totalorder %s205_s13, 0 }
   0x9   : > { %p219_p2 = scmp.eq.s32.totalorder %s1595_s9, 1  ;;  %p224_p3 = scmp.ne.s32.totalorder %s1510_s28, %s1506_s27 }
   0xa   : > { %p225_p4 = scmp.eq.s32.totalorder %s1008_s10, 1  ;;  %p1009_p7 = scmp.ge.s32.totalorder %s1518_s30, 1 }
   0xb   : > { %s1610_s14 = scalar_select %p206_p1, %s1514_s29, %s208_s12  }
   0xc   : > { %p1612_p5 = por %p219_p2, %p218_p0  ;;  %p1616_p6 = por %p225_p4, %p224_p3 }
   0xd   : > { %1826 = sst [smem:[#allocation14_spill]] %s1610_s14  ;;  %p232_p8 = scmp.lt.s32.totalorder %s1518_s30, 3 }
   0xe   : > { %s1827_s15 = scalar_select %p1612_p5, 1, 0 }
   0xf   : > { %s1828_s16 = scalar_select %p1616_p6, 1, 0 }
  0x10   : > { %p1821_p9 = scmp.eq.s32.totalorder %s1595_s9, 0  ;;  %p1623_p10 = pnand %p1009_p7, %p232_p8 }
  0x11   : > { %s1520_s18 = smov [#allocation4]   ;;  %s1521_s21 = smov [#allocation7]  }
  0x12   : > { %s1829_s17 = scalar_select %p1623_p10, 1, 0 }
  0x13   : > { %s244_s19 = sshll.u32 %s1520_s18, 4  ;;  %p1335_p11 = pneg %p1623_p10  ;;  %s245_s19 = int_to_ptr.vmem [resolvable:$true] %s244_s19 }
  0x14   : > { %s260_s22 = sshll.u32 %s1521_s21, 4  ;;  %s1392_s25 = scalar_lea.hbm %s1813_s1, 1536  ;;  %s1635_s22 = int_to_ptr.vmem [resolvable:$true] %s260_s22 }
  0x15   : > { %p1631_p12 = pnand %p1821_p9, %p1335_p11  ;;  %p1393_p13 = scmp.ne.s32.totalorder %s1813_s1, %s1392_s25 }
  0x16   : > { %p1399_p3 = scmp.lt.u32.totalorder %s1392_s25, %s1813_s1 }
  0x17   : > { %p1394_p0 = pneg %p1631_p12 }
  0x19   : > { %p1395_p1 = pnand %p1394_p0, %p1393_p13 }
  0x1b   : > { %p1396_p2 = pneg %p1395_p1 }
  0x1d   : > { %p1401_p4 = pnand %p1399_p3, %p1396_p2 }
  0x1f   : > { %1404 = shalt.err (!%p1401_p4)
}
  0x20   : > { %s1405_s18 = scalar_lea.vmem %s245_s19, 1536  ;;  %p1413_p9 = scmp.lt.s32.totalorder %s245_s19, %s245_s19 }
  0x21   : > { %p1406_p7 = scmp.ne.s32.totalorder %s245_s19, %s1405_s18  ;;  %p1414_p6 = scmp.lt.s32.totalorder %s1405_s18, %s1405_s18 }
  0x23   : > { %p1408_p8 = pnand %p1406_p7, %p1394_p0  ;;  %p1415_p5 = por %p1414_p6, %p1413_p9 }
  0x25   : > { %p1409_p11 = pneg %p1408_p8 }
  0x27   : > { %p1416_p10 = pnand %p1415_p5, %p1409_p11 }
  0x29   : > { %1419 = shalt.err (!%p1416_p10)
}
  0x2a   : > { %s1522_s21 = smov 128   ;;  %s1523_s23 = smov 8  }
  0x2b   : > { %1338 = dma.hbm_to_vmem [thread:$0]  (!%p1631_p12), %s1813_s1, 1536, %s245_s19, [#allocation5], %s1522_s21, %s1522_s21, %s1523_s23  }
  0x2c   : > { %s1420_s12 = scalar_lea.hbm %s1815_s3, 6144 }
  0x2d   : > { %p1421_p13 = scmp.ne.s32.totalorder %s1815_s3, %s1420_s12  ;;  %p1427_p9 = scmp.lt.u32.totalorder %s1420_s12, %s1815_s3 }
  0x2f   : > { %p1423_p5 = pnand %p1421_p13, %p1394_p0 }
  0x31   : > { %p1424_p6 = pneg %p1423_p5 }
  0x33   : > { %p1429_p10 = pnand %p1427_p9, %p1424_p6 }
  0x35   : > { %1432 = shalt.err (!%p1429_p10)
}
  0x36   : > { %s1433_s19 = scalar_lea.vmem %s1635_s22, 6144  ;;  %p1441_p4 = scmp.lt.s32.totalorder %s1635_s22, %s1635_s22 }
  0x37   : > { %p1434_p1 = scmp.ne.s32.totalorder %s1635_s22, %s1433_s19  ;;  %p1442_p7 = scmp.lt.s32.totalorder %s1433_s19, %s1433_s19 }
  0x39   : > { %p1436_p2 = pnand %p1434_p1, %p1394_p0  ;;  %p1443_p8 = por %p1442_p7, %p1441_p4 }
  0x3b   : > { %p1437_p3 = pneg %p1436_p2 }
  0x3d   : > { %p1444_p11 = pnand %p1443_p8, %p1437_p3 }
  0x3f   : > { %1447 = shalt.err (!%p1444_p11)
}
  0x40   : > { %1341 = dma.hbm_to_vmem [thread:$0]  (!%p1631_p12), %s1815_s3, 6144, %s1635_s22, [#allocation8], %s1522_s21, %s1522_s21, %s1523_s23  }
  0x41   : > { %p1831_p13 = scmp.ne.s32.totalorder %s1829_s17, 0 }
  0x42   : > { %p1832_p5 = scmp.eq.s32.totalorder (!%p1831_p13), %s1595_s9, 0 }
  0x43   : > { %300 = sbr.rel (%p1831_p13) target bundleno = 603 (0x25b), region = 52 }
  0x4a   : > { %1493 = dma.done.wait (%p1832_p5), [#allocation5], 1536   ;;  %p1833_p0 = pmov %p1832_p5 }
  0x4c   : > { %1495 = vsyncadd (%p1833_p0), [#allocation5], 4294965760  ;;  %p1834_p6 = pmov %p1833_p0 }
  0x4d   : > { %p1835_p9 = pmov %p1833_p0 }
  0x4e   : > { %1497 = dma.done.wait (%p1834_p6), [#allocation8], 6144  }
  0x4f   : > { %1499 = vsyncadd (%p1835_p9), [#allocation8], 4294961152  ;;  %p342_p10 = scmp.lt.s32.totalorder %s1595_s9, 1  ;;  %v1524_v0 = vmov 0.0|0.0   ;;  %vm1525_vm0 = vmmov 0   ;;  %v1526_v1 = vmov 0.0  }
  0x50   : > { %1235 = vmatprep.subr.bf16.mxu0 %v1524_v0  ;;  %1105 = vmatprep.mubr.msk.f32.mxu0 %vm1525_vm0, %v1526_v1  ;;  %607 = vst [vmem:[#allocation3] sm:$0x3f] %v1526_v1  ;;  %v367_v2 = vld [vmem:[#allocation4 + $0x20] sm:$0xff]  ;;  %v368_v3 = vld [vmem:[#allocation4 + $0x28] sm:$0xff]  ;;  %v369_v4 = vld [vmem:[#allocation4 + $0x30] sm:$0xff]  ;;  %vm355_vm1 = vcmask 261120  }
  0x51   : > { %s1700_s17 = scalar_select %p342_p10, %s1595_s9, 1  ;;  %1253 = vmatprep.subr.bf16.mxu1 %v1524_v0  ;;  %1162 = vmatprep.mubr.msk.f32.mxu1 %vm1525_vm0, %v1526_v1  ;;  %v1236_v5 = vpack.c.bf16 %v368_v3, %v367_v2  ;;  %v370_v6 = vld [vmem:[#allocation4 + $0x38] sm:$0xff]  ;;  %vm357_vm2 = vcmask 254976   ;;  %v629_v12 = vld [vmem:[#allocation7 + $0x80] sm:$0xff]  ;;  %v630_v13 = vld [vmem:[#allocation7 + $0x88] sm:$0xff] }
  0x52   : > { %v1239_v11 = vpack.c.bf16 %v370_v6, %v369_v4  ;;  %v360_v14 = vld [vmem:[#allocation4] sm:$0xff]  ;;  %v361_v15 = vld [vmem:[#allocation4 + $0x8] sm:$0xff]  ;;  %v1254_v16 = vpack.c.bf16 %v630_v13, %v629_v12  ;;  %v362_v18 = vld [vmem:[#allocation4 + $0x10] sm:$0xff]  ;;  %v1527_v13 = vmov 0   ;;  %s339_s18 = sand.u32 1, %s1510_s28   ;;  %p1836_p1 = scmp.ne.s32.totalorder %s1827_s15, 0 }
  0x53   : > { %s1030_s20 = sshll.u32 %s1700_s17, 3  ;;  %1237 = vmatpush3.bf16.msra.mxu0 %v1236_v5  ;;  %v1242_v17 = vpack.c.bf16 %v361_v15, %v360_v14  ;;  %v363_v19 = vld [vmem:[#allocation4 + $0x18] sm:$0xff]  ;;  %v520_v22 = vld [vmem:[#allocation4 + $0x40] sm:$0xff]  ;;  %v521_v23 = vld [vmem:[#allocation4 + $0x48] sm:$0xff]  ;;  %s1019_s24 = sshll.u32 %s1700_s17, 1  ;;  %1391 = vset.pattern.permute.xlu0 %v1527_v13 }
  0x54   : > { %s346_s23 = scalar_lea.vmem %s1812_s0, %s1030_s20  ;;  %1238 = vmatprep.subr.bf16.mxu0 %v1524_v0  ;;  %1255 = vmatpush3.bf16.msra.mxu1 %v1254_v16  ;;  %v1245_v21 = vpack.c.bf16 %v363_v19, %v362_v18  ;;  %v1248_v25 = vpack.c.bf16 %v521_v23, %v520_v22  ;;  %v522_v26 = vld [vmem:[#allocation4 + $0x50] sm:$0xff]  ;;  %v523_v27 = vld [vmem:[#allocation4 + $0x58] sm:$0xff]  ;;  %v610_v29 = vld [vmem:[#allocation7] sm:$0xff]  ;;  %s350_s10 = scalar_lea.vmem %s1818_s6, %s1019_s24 }
  0x55   : > { %v351_v7 = vld [vmem:[%s346_s23] sm:$0xf]  ;;  %v352_v8 = vld [vmem:[%s346_s23 + $0x4] sm:$0x1]  ;;  %1256 = vmatprep.subr.bf16.mxu1 %v1524_v0  ;;  %v1251_v28 = vpack.c.bf16 %v523_v27, %v522_v26  ;;  %v631_v33 = vld [vmem:[#allocation7 + $0x90] sm:$0xff]  ;;  %s1016_s19 = sshll.u32 %s339_s18, 1 }
  0x56   : > { %v353_v9 = vunpack.c.l.bf16 %v351_v7  ;;  %v354_v10 = vunpack.c.l.bf16 %v352_v8  ;;  %v611_v30 = vld [vmem:[#allocation7 + $0x8] sm:$0xff]  ;;  %v632_v34 = vld [vmem:[#allocation7 + $0x98] sm:$0xff]  ;;  %v612_v36 = vld [vmem:[#allocation7 + $0x10] sm:$0xff]  ;;  %s1027_s23 = sshll.u32 %s1595_s9, 5  ;;  %s341_s24 = scalar_lea.vmem [#allocation9], %s1016_s19 }
  0x57   : > { %1240 = vmatpush3.bf16.msra.mxu0 %v1239_v11  ;;  %v1278_v32 = vpack.c.bf16 %v611_v30, %v610_v29  ;;  %v1257_v35 = vpack.c.bf16 %v632_v34, %v631_v33  ;;  %v613_v37 = vld [vmem:[#allocation7 + $0x18] sm:$0xff]  ;;  %v633_v38 = vld [vmem:[#allocation7 + $0xa0] sm:$0xff]  ;;  %v634_v40 = vld [vmem:[#allocation7 + $0xa8] sm:$0xff]  ;;  %s915_s25 = sshll.u32 %s341_s24, 4  ;;  %s1770_s12 = scalar_lea.hbm %s1820_s8, %s1027_s23  ;;  %s1772_s25 = int_to_ptr.vmem [resolvable:$true] %s915_s25 }
  0x58   : > { %356 = vst.msk [vmem:[#allocation2] sm:$0xff] %vm355_vm1, %v353_v9  ;;  %1241 = vmatprep.subr.bf16.mxu0 %v1524_v0  ;;  %v1281_v39 = vpack.c.bf16 %v613_v37, %v612_v36  ;;  %v1260_v41 = vpack.c.bf16 %v634_v40, %v633_v38  ;;  %v614_v42 = vld [vmem:[#allocation7 + $0x20] sm:$0xff]  ;;  %v615_v43 = vld [vmem:[#allocation7 + $0x28] sm:$0xff]  ;;  %v635_v45 = vld [vmem:[#allocation7 + $0xb0] sm:$0xff]  ;;  %s902_s13 = scalar_lea.sflag [#allocation6], %s339_s18  ;;  %s1448_s29 = scalar_lea.vmem %s1772_s25, 32 }
  0x59   : > { %358 = vst.msk [vmem:[#allocation2 + $0x8] sm:$0x3] %vm357_vm2, %v354_v10  ;;  %1258 = vmatpush3.bf16.msra.mxu1 %v1257_v35  ;;  %v1284_v44 = vpack.c.bf16 %v615_v43, %v614_v42  ;;  %v636_v46 = vld [vmem:[#allocation7 + $0xb8] sm:$0xff]  ;;  %v616_v48 = vld [vmem:[#allocation7 + $0x30] sm:$0xff]  ;;  %v637_v50 = vld [vmem:[#allocation7 + $0xc0] sm:$0xff]  ;;  %p1449_p12 = scmp.ne.s32.totalorder %s1772_s25, %s1448_s29  ;;  %s1528_s9 = smov [#allocation9]  }
  0x5a   : > { %1259 = vmatprep.subr.bf16.mxu1 %v1524_v0  ;;  %v1263_v47 = vpack.c.bf16 %v636_v46, %v635_v45  ;;  %v617_v49 = vld [vmem:[#allocation7 + $0x38] sm:$0xff]  ;;  %v638_v52 = vld [vmem:[#allocation7 + $0xc8] sm:$0xff]  ;;  %v618_v54 = vld [vmem:[#allocation7 + $0x40] sm:$0xff]  ;;  %s1452_s19 = sshll.u32 %s1528_s9, 4  ;;  %s1453_s19 = int_to_ptr.vmem [resolvable:$false] %s1452_s19 }
  0x5b   : > { %v1287_v51 = vpack.c.bf16 %v617_v49, %v616_v48  ;;  %v1266_v53 = vpack.c.bf16 %v638_v52, %v637_v50  ;;  %v619_v55 = vld [vmem:[#allocation7 + $0x48] sm:$0xff]  ;;  %v639_v57 = vld [vmem:[#allocation7 + $0xd0] sm:$0xff]  ;;  %v640_v58 = vld [vmem:[#allocation7 + $0xd8] sm:$0xff]  ;;  %p1450_p2 = pnand %p1449_p12, %p1836_p1  ;;  %s1454_s14 = scalar_lea.vmem %s1453_s19, 64 }
  0x5c   : > { %v1290_v56 = vpack.c.bf16 %v619_v55, %v618_v54  ;;  %v1269_v59 = vpack.c.bf16 %v640_v58, %v639_v57  ;;  %v620_v60 = vld [vmem:[#allocation7 + $0x50] sm:$0xff]  ;;  %v621_v61 = vld [vmem:[#allocation7 + $0x58] sm:$0xff]  ;;  %v641_v63 = vld [vmem:[#allocation7 + $0xe0] sm:$0xff]  ;;  %p1455_p4 = scmp.lt.s32.totalorder %s1772_s25, %s1453_s19  ;;  %p1456_p7 = scmp.lt.s32.totalorder %s1454_s14, %s1448_s29 }
  0x5d   : > { %1261 = vmatpush3.bf16.msra.mxu1 %v1260_v41  ;;  %v1293_v62 = vpack.c.bf16 %v621_v61, %v620_v60  ;;  %v642_v2 = vld [vmem:[#allocation7 + $0xe8] sm:$0xff]  ;;  %v622_v4 = vld [vmem:[#allocation7 + $0x60] sm:$0xff]  ;;  %v643_v7 = vld [vmem:[#allocation7 + $0xf0] sm:$0xff]  ;;  %p1451_p3 = pneg %p1450_p2 }
  0x5e   : > { %1262 = vmatprep.subr.bf16.mxu1 %v1524_v0  ;;  %v1272_v3 = vpack.c.bf16 %v642_v2, %v641_v63  ;;  %v623_v5 = vld [vmem:[#allocation7 + $0x68] sm:$0xff]  ;;  %v644_v8 = vld [vmem:[#allocation7 + $0xf8] sm:$0xff]  ;;  %v624_v9 = vld [vmem:[#allocation7 + $0x70] sm:$0xff]  ;;  %p1457_p8 = por %p1456_p7, %p1455_p4 }
  0x5f   : > { %v365_v20 = vld [vmem:[#allocation2 + $0x1] ss:$2 sm:$0xf]  ;;  %v359_v24 = vld [vmem:[#allocation2] ss:$2 sm:$0xf]  ;;  %v1296_v6 = vpack.c.bf16 %v623_v5, %v622_v4  ;;  %v1275_v10 = vpack.c.bf16 %v644_v8, %v643_v7 }
  0x60   : > { %1106 = vmatmul.mubr.msk.f32.vlgmr.msra.gmra.mrb[0].mxu0 %vm355_vm1, %v365_v20  ;;  %v518_v31 = vld [vmem:[#allocation2 + $0x2] ss:$2 sm:$0xf]  ;;  %v625_v11 = vld [vmem:[#allocation7 + $0x78] sm:$0xff]  ;;  %v883_v14 = vld [vmem:[%s350_s10] sm:$0x3]  ;;  %p1458_p11 = pnand %p1457_p8, %p1451_p3 }
  0x61   : > { %1243 = vmatpush3.bf16.msra.mxu0 %v1242_v17  ;;  %1116 = vmatprep.mubr.msk.f32.mxu0 %vm1525_vm0, %v1526_v1  ;;  %v1299_v12 = vpack.c.bf16 %v625_v11, %v624_v9  ;;  %vm884_vm3 = vcmp.gt.f32.partialorder %v883_v14, 0.5  ;;  %v1023_v22 = vld [vmem:[%s1814_s2] ss:$0 sm:$0xff]  ;;  %v788_v27 = vld [vmem:[#allocation7 + $0x100] sm:$0xff]  ;;  %v790_v30 = vld [vmem:[#allocation7 + $0x110] sm:$0xff] }
  0x62   : > { %1244 = vmatprep.subr.bf16.mxu0 %v1524_v0  ;;  %1264 = vmatpush3.bf16.msra.mxu1 %v1263_v47  ;;  %v886_v15 = vsel %vm884_vm3, 1, %v1527_v13  ;;  %v792_v35 = vld [vmem:[#allocation7 + $0x120] sm:$0xff]  ;;  %v793_v36 = vld [vmem:[#allocation7 + $0x128] sm:$0xff]  ;;  %v794_v38 = vld [vmem:[#allocation7 + $0x130] sm:$0xff] }
  0x63   : > { %1265 = vmatprep.subr.bf16.mxu1 %v1524_v0  ;;  %888 = vperm.xlu0 %1391, %v886_v15   ;;  %v1308_v37 = vpack.c.bf16 %v793_v36, %v792_v35  ;;  %v796_v41 = vld [vmem:[#allocation7 + $0x140] sm:$0xff]  ;;  %v797_v42 = vld [vmem:[#allocation7 + $0x148] sm:$0xff]  ;;  %v802_v49 = vld [vmem:[#allocation7 + $0x170] sm:$0xff] }
  0x64   : > { %v1314_v43 = vpack.c.bf16 %v797_v42, %v796_v41  ;;  %v800_v46 = vld [vmem:[#allocation7 + $0x160] sm:$0xff]  ;;  %v801_v47 = vld [vmem:[#allocation7 + $0x168] sm:$0xff]  ;;  %v803_v50 = vld [vmem:[#allocation7 + $0x178] sm:$0xff] }
  0x65   : > { %1246 = vmatpush3.bf16.msra.mxu0 %v1245_v21  ;;  %v1320_v48 = vpack.c.bf16 %v801_v47, %v800_v46  ;;  %v1024_v60 = vld [vmem:[%s1816_s4] ss:$0 sm:$0xff] }
  0x66   : > { %1247 = vmatprep.subr.bf16.mxu0 %v1524_v0  ;;  %1267 = vmatpush3.bf16.msra.mxu1 %v1266_v53  ;;  %v898_v2 = vld [vmem:[%s1819_s7] sm:$0x3] }
  0x67   : > { %1268 = vmatprep.subr.bf16.mxu1 %v1524_v0 }
  0x68   : > { %1117 = vmatmul.mubr.msk.f32.vlgmr.msra.gmra.mrb[2].mxu0 %vm355_vm1, %v359_v24 }
  0x69   : > { %1249 = vmatpush3.bf16.msra.mxu0 %v1248_v25  ;;  %1127 = vmatprep.mubr.msk.f32.mxu0 %vm1525_vm0, %v1526_v1 }
  0x6a   : > { %1250 = vmatprep.subr.bf16.mxu0 %v1524_v0  ;;  %1270 = vmatpush3.bf16.msra.mxu1 %v1269_v59 }
  0x6b   : > { %1271 = vmatprep.subr.bf16.mxu1 %v1524_v0 }
  0x6d   : > { %1252 = vmatpush3.bf16.msra.mxu0 %v1251_v28  ;;  %v789_v28 = vld [vmem:[#allocation7 + $0x108] sm:$0xff] }
  0x6e   : > { %1277 = vmatprep.subr.bf16.mxu0 %v1524_v0  ;;  %1273 = vmatpush3.bf16.msra.mxu1 %v1272_v3  ;;  %v1302_v29 = vpack.c.bf16 %v789_v28, %v788_v27 }
  0x6f   : > { %1274 = vmatprep.subr.bf16.mxu1 %v1524_v0 }
  0x70   : > { %1128 = vmatmul.mubr.msk.f32.vlgmr.msra.gmra.mrb[4].mxu0 %vm355_vm1, %v518_v31  ;;  %v791_v31 = vld [vmem:[#allocation7 + $0x118] sm:$0xff] }
  0x71   : > { %1279 = vmatpush3.bf16.msra.mxu0 %v1278_v32  ;;  %1197 = vmatprep.mubr.msk.f32.mxu0 %vm1525_vm0, %v1526_v1  ;;  %v1305_v34 = vpack.c.bf16 %v791_v31, %v790_v30 }
  0x72   : > { %1280 = vmatprep.subr.bf16.mxu0 %v1524_v0  ;;  %1276 = vmatpush3.bf16.msra.mxu1 %v1275_v10 }
  0x73   : > { %1301 = vmatprep.subr.bf16.mxu1 %v1524_v0 }
  0x75   : > { %1282 = vmatpush3.bf16.msra.mxu0 %v1281_v39  ;;  %v795_v39 = vld [vmem:[#allocation7 + $0x138] sm:$0xff] }
  0x76   : > { %1283 = vmatprep.subr.bf16.mxu0 %v1524_v0  ;;  %v1311_v40 = vpack.c.bf16 %v795_v39, %v794_v38 }
  0x79   : > { %1285 = vmatpush3.bf16.msra.mxu0 %v1284_v44  ;;  %v799_v44 = vld [vmem:[#allocation7 + $0x158] sm:$0xff] }
  0x7a   : > { %1286 = vmatprep.subr.bf16.mxu0 %v1524_v0 }
  0x7d   : > { %1288 = vmatpush3.bf16.msra.mxu0 %v1287_v51  ;;  %v1323_v51 = vpack.c.bf16 %v803_v50, %v802_v49 }
  0x7e   : > { %1289 = vmatprep.subr.bf16.mxu0 %v1524_v0 }
  0x81   : > { %1291 = vmatpush3.bf16.msra.mxu0 %v1290_v56 }
  0x82   : > { %1292 = vmatprep.subr.bf16.mxu0 %v1524_v0 }
  0x85   : > { %1294 = vmatpush3.bf16.msra.mxu0 %v1293_v62 }
  0x86   : > { %1295 = vmatprep.subr.bf16.mxu0 %v1524_v0 }
  0x89   : > { %1297 = vmatpush3.bf16.msra.mxu0 %v1296_v6 }
  0x8a   : > { %1298 = vmatprep.subr.bf16.mxu0 %v1524_v0 }
  0x8d   : > { %1300 = vmatpush3.bf16.msra.mxu0 %v1299_v12 }
  0xe2   : > { %v889_v58 = vpop.permute.xlu0 %888 }
  0xe3   : > { %vm890_vm4 = vcmp.eq.s32.totalorder %v889_v58, 1 }
 0x133   : > { %v440_v16 = vpop.f32.mrb[0].mxu0 }
 0x134   : > { %v1107_v17 = vpop.f32.mrb[1].mxu0 }
 0x13b   : > { %v513_v18 = vpop.f32.mrb[2].mxu0 }
 0x13c   : > { %v514_v19 = vadd.f32 %v513_v18, %v440_v16  ;;  %v1118_v20 = vpop.f32.mrb[3].mxu0 }
 0x143   : > { %v593_v21 = vpop.f32.mrb[4].mxu0 }
 0x144   : > { %v597_v23 = vadd.f32 %v593_v21, %v514_v19  ;;  %v1129_v24 = vpop.f32.mrb[5].mxu0 }
 0x146   : > { %v605_v25 = vadd.f32 %v1023_v22, %v597_v23 }
 0x148   : > { %v606_v26 = vmax.f32 %v605_v25, 0.0 }
 0x14a   : > { %608 = vst [vmem:[#allocation3 + $0x1] sm:$0xf] %v606_v26 }
 0x151   : > { %v627_v32 = vld [vmem:[#allocation3 + $0x1] ss:$2 sm:$0x3]  ;;  %v609_v33 = vld [vmem:[#allocation3] ss:$2 sm:$0x3] }
 0x152   : > { %1163 = vmatmul.mubr.f32.vlgmr.msra.gmra.mrb[0].mxu1 %v627_v32  ;;  %1198 = vmatmul.mubr.f32.vlgmr.msra.gmra.mrb[6].mxu0 %v609_v33  ;;  %v786_v52 = vld [vmem:[#allocation3 + $0x2] ss:$2 sm:$0x3] }
 0x153   : > { %1303 = vmatpush3.bf16.msra.mxu1 %v1302_v29  ;;  %1232 = vmatprep.mubr.msk.f32.mxu1 %vm1525_vm0, %v1526_v1  ;;  %v798_v1 = vld [vmem:[#allocation7 + $0x150] sm:$0xff] }
 0x154   : > { %1304 = vmatprep.subr.bf16.mxu1 %v1524_v0  ;;  %v1317_v45 = vpack.c.bf16 %v799_v44, %v798_v1 }
 0x157   : > { %1306 = vmatpush3.bf16.msra.mxu1 %v1305_v34 }
 0x158   : > { %1307 = vmatprep.subr.bf16.mxu1 %v1524_v0 }
 0x15b   : > { %1309 = vmatpush3.bf16.msra.mxu1 %v1308_v37 }
 0x15c   : > { %1310 = vmatprep.subr.bf16.mxu1 %v1524_v0 }
 0x15f   : > { %1312 = vmatpush3.bf16.msra.mxu1 %v1311_v40 }
 0x160   : > { %1313 = vmatprep.subr.bf16.mxu1 %v1524_v0 }
 0x163   : > { %1315 = vmatpush3.bf16.msra.mxu1 %v1314_v43 }
 0x164   : > { %1316 = vmatprep.subr.bf16.mxu1 %v1524_v0 }
 0x167   : > { %1318 = vmatpush3.bf16.msra.mxu1 %v1317_v45 }
 0x168   : > { %1319 = vmatprep.subr.bf16.mxu1 %v1524_v0 }
 0x16b   : > { %1321 = vmatpush3.bf16.msra.mxu1 %v1320_v48 }
 0x16c   : > { %1322 = vmatprep.subr.bf16.mxu1 %v1524_v0  ;;  %v1025_v0 = vld [vmem:[%s1817_s5] ss:$0 sm:$0xff] }
 0x16f   : > { %1324 = vmatpush3.bf16.msra.mxu1 %v1323_v51 }
 0x172   : > { %1233 = vmatmul.mubr.f32.vlgmr.msra.gmra.mrb[2].mxu1 %v786_v52 }
 0x225   : > { %v711_v53 = vpop.f32.mrb[0].mxu1  ;;  %v781_v54 = vpop.f32.mrb[6].mxu0 }
 0x226   : > { %v782_v55 = vadd.f32 %v781_v54, %v711_v53  ;;  %v1164_v56 = vpop.f32.mrb[1].mxu1  ;;  %v1199_v57 = vpop.f32.mrb[7].mxu0 }
 0x245   : > { %v870_v59 = vpop.f32.mrb[2].mxu1 }
 0x246   : > { %v874_v61 = vadd.f32 %v870_v59, %v782_v55  ;;  %v1234_v62 = vpop.f32.mrb[3].mxu1 }
 0x248   : > { %v882_v63 = vadd.f32 %v1024_v60, %v874_v61 }
 0x24a   : > { %v897_v3 = vsel %vm890_vm4, %v1025_v0, %v882_v63 }
 0x24b   : > { %v899_v4 = vadd.f32 %v898_v2, %v897_v3 }
 0x24d   : > { %900 = vst [vmem:[%s341_s24] sm:$0x3] %v899_v4 }
 0x24e   : > { %1461 = shalt.err (!%p1458_p11)
}
 0x24f   : > { %s1462_s18 = scalar_lea.hbm %s1770_s12, 32  ;;  %s1466_s22 = scalar_lea.hbm %s1820_s8, 64 }
 0x250   : > { %p1463_p13 = scmp.ne.s32.totalorder %s1770_s12, %s1462_s18  ;;  %p1467_p6 = scmp.lt.u32.totalorder %s1770_s12, %s1820_s8 }
 0x251   : > { %p1468_p9 = scmp.lt.u32.totalorder %s1466_s22, %s1462_s18  ;;  %p1470_p12 = scmp.lt.u32.totalorder %s1462_s18, %s1770_s12 }
 0x252   : > { %p1464_p5 = pnand %p1463_p13, %p1836_p1 }
 0x253   : > { %p1469_p10 = por %p1468_p9, %p1467_p6 }
 0x254   : > { %p1465_p0 = pneg %p1464_p5 }
 0x255   : > { %p1471_p2 = por %p1470_p12, %p1469_p10 }
 0x257   : > { %p1472_p3 = pnand %p1471_p2, %p1465_p0 }
 0x259   : > { %1475 = shalt.err (!%p1472_p3)
}
 0x25a   : > { %1333 = dma.vmem_to_hbm [thread:$0]  (%p1836_p1), %s1772_s25, 32, %s1770_s12, %s902_s13  }
 0x25b PF: > { %p1350_p4 = scmp.ge.s32.totalorder %s1518_s30, 2  ;;  %s927_s24 = sand.u32 1, %s1506_s27  }
 0x25c   : > { %p1837_p7 = scmp.ne.s32.totalorder %s1828_s16, 0  ;;  %s928_s26 = scalar_lea.sflag [#allocation6], %s927_s24 }
 0x25e   : > { %p1343_p8 = pnand %p1350_p4, %p1837_p7 }
 0x260   : > { %1501 = dma.done.wait (!%p1343_p8), %s928_s26, 32  }
 0x261   : > { %1503 = vsyncadd (!%p1343_p8), %s928_s26, 4294967264  ;;  %s1838_s10 = sld [smem:[#allocation13_spill]]  ;;  %s1839_s29 = sld [smem:[#allocation14_spill]] }
 0x262   : > { %p20_p11 = scmp.ge.s32.totalorder %s1599_s11, 4   ;;  %s1840_s27 = smov %s1510_s28 }
 0x263   : > { %s1842_s30 = smov %s1599_s11 }
 0x264   :  { %22 = sbr.rel (!%p20_p11) target bundleno = 5 (0x5), region = 107 }
 0x267   : > { %s1841_s28 = smov %s1838_s10 }
 0x26b   :  { %933 = vsyncpa [#allocation5], 1 }
 0x26c   :  { %935 = vsyncpa [#allocation5 + $0x1], 1 }
 0x26d   :  { %936 = vsyncpa [#allocation8], 1 }
 0x26e   :  { %937 = vsyncpa [#allocation6], 1 }
 0x26f   :  { %939 = vsyncpa [#allocation6 + $0x1], 1 }

</bundles_post_ra>
